<compile_context>
chip_gen: v6e
topology: v6e:2x2x1
jax: 0.10.0
libtpu: 0.0.40
codegen_flags: <defaults>
</compile_context>

<pallas_src>
import jax
import jax.numpy as jnp
from jax.experimental import pallas as pl
from jax.experimental.pallas import tpu as pltpu

_MIB = 1024 * 1024


# ---------------------------------------------------------------------------
# Kernels
# ---------------------------------------------------------------------------
def _scale_kernel_smem(scale_ref, x_ref, o_ref):
    # One scalar SMEM load per grid step; fully hidden under the HBM DMA.
    o_ref[...] = (x_ref[...] * scale_ref[0, 0]).astype(o_ref.dtype)


def _make_scale_kernel_const(scale):
    # Opt-in fast path for literal Python floats (no SMEM operand at all).
    def kernel(x_ref, o_ref):
        o_ref[...] = (x_ref[...] * scale).astype(o_ref.dtype)
    return kernel


# ---------------------------------------------------------------------------
# Hardware-gated block / VMEM budgets
# ---------------------------------------------------------------------------
def _pick_budgets():
    vmem = None
    try:
        vmem = int(pltpu.get_tpu_info().vmem_capacity_bytes)
    except Exception:
        pass
    kind = ""
    try:
        kind = jax.devices()[0].device_kind.lower()
    except Exception:
        pass
    if vmem is None:
        vmem = 64 * _MIB  # conservative (v7x per-TC VMEM)

    if ("v5e" in kind) or ("v5 lite" in kind) or ("v5lite" in kind):
        # v5e (~0.82 TB/s): per-step overhead already small at 2-4 MiB blocks.
        block_bytes = 4 * _MIB
        vmem_limit = 32 * _MIB
    else:
        # v6e (128 MiB VMEM) / v7x (64 MiB VMEM): big blocks amortize the
        # ~0.35 us per-grid-step overhead at 1.4-3.2 TB/s HBM.
        # 1 input + 1 output, double-buffered -> 4 live blocks.
        block_bytes = min(8 * _MIB, max(2 * _MIB, vmem // 8))
        vmem_limit = min(vmem * 3 // 4, 64 * _MIB)
    return block_bytes, vmem_limit


# ---------------------------------------------------------------------------
# Wrapper
# ---------------------------------------------------------------------------
def pallas_scale(x: jax.Array, scale, *, static_scale: bool = False) -> jax.Array:
    """Elementwise x * scale via a Pallas TPU kernel (any input shape)."""
    orig_shape = x.shape
    n = x.size
    # PyTorch-style promotion (e.g. int tensor * python float -> float32,
    # bf16 tensor * python float -> bf16).
    out_dtype = jnp.result_type(x.dtype, scale)
    if n == 0:
        return (x * scale).astype(out_dtype).reshape(orig_shape)

    itemsize = max(jnp.dtype(x.dtype).itemsize, jnp.dtype(out_dtype).itemsize)
    total_bytes = n * itemsize
    block_bytes, vmem_limit = _pick_budgets()

    if static_scale:
        kernel = _make_scale_kernel_const(float(scale))
        scalar_args = ()
        scalar_specs = []
    else:
        kernel = _scale_kernel_smem
        scale_arr = jnp.asarray(scale, dtype=jnp.float32).reshape(1, 1)
        scalar_args = (scale_arr,)
        scalar_specs = [pl.BlockSpec(memory_space=pltpu.MemorySpace.SMEM)]

    x_flat = x.reshape(-1)  # contiguous view: free

    # ---- lane-dense layout, no pad / no extra HBM passes ----
    width = 0
    for cand in (8192, 4096, 2048, 1024, 512, 256, 128):
        if n % cand == 0:
            width = cand
            break

    if width:
        # 2D slab (rows, width): wide, unmasked vector stores.
        rows = n // width
        row_tile = max(8, (block_bytes // (width * itemsize)) // 8 * 8)
        if total_bytes >= (512 * 1024):
            # Keep >= ~4 grid steps so the pipeline overlaps DMA-in(i+1),
            # compute(i), DMA-out(i-1), and v7x can shard across its 2 TCs.
            cap = max(8, (rows // 4) // 8 * 8)
            row_tile = min(row_tile, cap)
        if row_tile >= rows:
            row_tile = rows  # full-dim block: always legal (small tensors)
        grid = (pl.cdiv(rows, row_tile),)
        x_view = x_flat.reshape(rows, width)
        in_block = pl.BlockSpec((row_tile, width), lambda i: (i, 0))
        out_block = pl.BlockSpec((row_tile, width), lambda i: (i, 0))
        out_shape = jax.ShapeDtypeStruct((rows, width), out_dtype)
    else:
        # Ragged element count: stay 1D and let Pallas mask the partial
        # final block (no jnp.pad, no trailing slice).
        chunk = max(1024, (block_bytes // itemsize) // 1024 * 1024)
        if total_bytes >= (512 * 1024):
            cap = max(1024, (n // 4) // 1024 * 1024)
            chunk = min(chunk, cap)
        if chunk >= n:
            chunk = n  # full-dim block: always legal
        grid = (pl.cdiv(n, chunk),)
        x_view = x_flat
        in_block = pl.BlockSpec((chunk,), lambda i: (i,))
        out_block = pl.BlockSpec((chunk,), lambda i: (i,))
        out_shape = jax.ShapeDtypeStruct((n,), out_dtype)

    out = pl.pallas_call(
        kernel,
        out_shape=out_shape,
        grid=grid,
        in_specs=list(scalar_specs) + [in_block],
        out_specs=out_block,
        compiler_params=pltpu.CompilerParams(
            dimension_semantics=("parallel",),
            vmem_limit_bytes=vmem_limit,
        ),
    )(*scalar_args, x_view)

    return out.reshape(orig_shape)


if __name__ == "__main__":
    key = jax.random.PRNGKey(0)
    # Small NCHW input consistent with the module's usage in a conv pipeline.
    x = jax.random.normal(key, (2, 4, 16, 16), dtype=jnp.float32)
    scale = 1.0 / 255.0  # typical pixel scaling

    # General path: scale as a runtime SMEM scalar (no recompile per value).
    y = pallas_scale(x, scale)
    jax.block_until_ready(y)
    y_ref = x * scale
    assert y.shape == x.shape and y.dtype == y_ref.dtype
    assert jnp.allclose(y, y_ref, atol=1e-6, rtol=1e-6)

    # Ragged element count: exercises the no-pad 1D masked-block path.
    x2 = jax.random.normal(jax.random.PRNGKey(1), (3, 5, 7), dtype=jnp.float32)
    y2 = pallas_scale(x2, 0.5)
    jax.block_until_ready(y2)
    assert jnp.allclose(y2, x2 * 0.5, atol=1e-6, rtol=1e-6)

    # Opt-in compile-time-constant fast path.
    y3 = pallas_scale(x, scale, static_scale=True)
    jax.block_until_ready(y3)
    assert jnp.allclose(y3, y_ref, atol=1e-6, rtol=1e-6)

    print("KERNEL_OK")
</pallas_src>

<mosaic_0001>
module attributes {stable_mosaic.version = 11 : i64} {
  func.func @_scale_kernel_smem(%arg0: i32, %arg1: memref<1x1xf32, #tpu.memory_space<smem>>, %arg2: memref<1x2048xf32, #tpu.memory_space<vmem>>, %arg3: memref<1x2048xf32, #tpu.memory_space<vmem>>) attributes {dimension_semantics = [#tpu.dimension_semantics<parallel>], iteration_bounds = array<i64: 1>, scalar_prefetch = 0 : i64, scratch_operands = 0 : i64, tpu.core_type = #tpu.core_type<tc>, window_params = [{transform_indices = @transform_0, window_bounds = array<i64: 1, 1>}, {transform_indices = @transform_1, window_bounds = array<i64: 1, 2048>}, {transform_indices = @transform_2, window_bounds = array<i64: 1, 2048>}]} {
    %c0 = arith.constant 0 : index
    %c0_0 = arith.constant 0 : index
    %0 = vector.load %arg2[%c0, %c0_0] : memref<1x2048xf32, #tpu.memory_space<vmem>>, vector<1x2048xf32>
    %c0_1 = arith.constant 0 : index
    %c0_2 = arith.constant 0 : index
    %1 = memref.load %arg1[%c0_1, %c0_2] : memref<1x1xf32, #tpu.memory_space<smem>>
    %2 = vector.broadcast %1 : f32 to vector<1x2048xf32>
    %3 = arith.mulf %0, %2 : vector<1x2048xf32>
    %c0_3 = arith.constant 0 : index
    %c0_4 = arith.constant 0 : index
    %4 = vector.load %arg3[%c0_3, %c0_4] : memref<1x2048xf32, #tpu.memory_space<vmem>>, vector<1x2048xf32>
    tpu.vector_store %arg3[%c0_3, %c0_4], %3 {strides = array<i32>} : memref<1x2048xf32, #tpu.memory_space<vmem>>, vector<1x2048xf32>,
    return
  }
  func.func @transform_0(%arg0: i32) -> (i32, i32) {
    %c0_i32 = arith.constant 0 : i32
    %c0_i32_0 = arith.constant 0 : i32
    %c0_i32_1 = arith.constant 0 : i32
    return %c0_i32, %c0_i32_0 : i32, i32
  }
  func.func @transform_1(%arg0: i32) -> (i32, i32) {
    %c0_i32 = arith.constant 0 : i32
    %c0_i32_0 = arith.constant 0 : i32
    return %arg0, %c0_i32 : i32, i32
  }
  func.func @transform_2(%arg0: i32) -> (i32, i32) {
    %c0_i32 = arith.constant 0 : i32
    %c0_i32_0 = arith.constant 0 : i32
    return %arg0, %c0_i32 : i32, i32
  }
}

</mosaic_0001>

<bundles_post_ra>
// kernel: tpu_custom_call.1
= control target key start
LH: loop header
LB: loop body
LE: loop exit
PB: predicated region body
PF: predicated region fallthrough
CT: control target
= control target key end

     0   :  { %8 = vsyncpa [#allocation4], 0  ;;  %s120_s0 = inlined_call_operand.<no memory space> [shape: f32[1,1], index: 0, kind: input, shape index: {}]   ;;  %s121_s1 = inlined_call_operand.hbm [shape: f32[1,2048], index: 1, kind: input, shape index: {}]   ;;  %s122_s2 = inlined_call_operand.hbm [shape: f32[1,2048], index: 2, kind: output, shape index: {}]  }
   0x1   :  { %9 = vsyncpa [#allocation5], 0  ;;  %s94_s9 = smov [#allocation3]  }
   0x2   :  { %s18_s10 = sshll.u32 %s94_s9, 4  ;;  %s19_s10 = int_to_ptr.vmem [resolvable:$true] %s18_s10 }
   0x3   :  { %s58_s11 = scalar_lea.vmem %s19_s10, 256  ;;  %p63_p1 = scmp.lt.s32.totalorder %s19_s10, %s19_s10 }
   0x4   :  { %p59_p0 = scmp.ne.s32.totalorder %s19_s10, %s58_s11  ;;  %p64_p2 = scmp.lt.s32.totalorder %s58_s11, %s58_s11 }
   0x6   :  { %p65_p3 = por %p64_p2, %p63_p1 }
   0x8   :  { %p66_p4 = pnand %p65_p3, %p59_p0 }
   0xa   :  { %69 = shalt.err (!%p66_p4)
}
   0xb   :  { %21 = dma.hbm_to_vmem [thread:$0]  %s121_s1, 256, %s19_s10, [#allocation4]  }
   0xc   :  { %90 = dma.done.wait [#allocation4], 256  }
   0xd   :  { %91 = vsyncadd [#allocation4], 4294967040  ;;  %v28_v0 = vstv %s120_s0  ;;  %s95_s16 = smov [#allocation6]   ;;  %v25_v1 = vld [vmem:[#allocation3] sm:$0xff]  ;;  %v26_v2 = vld [vmem:[#allocation3 + $0x8] sm:$0xff] }
   0xe   :  { %s39_s17 = sshll.u32 %s95_s16, 4  ;;  %v29_v3 = vmul.f32 %v28_v0, %v25_v1  ;;  %v30_v4 = vmul.f32 %v28_v0, %v26_v2  ;;  %s40_s17 = int_to_ptr.vmem [resolvable:$true] %s39_s17 }
   0xf   :  { %s70_s18 = scalar_lea.vmem %s40_s17, 256  ;;  %p75_p6 = scmp.lt.s32.totalorder %s40_s17, %s40_s17 }
  0x10   :  { %31 = vst [vmem:[#allocation6] sm:$0xff] %v29_v3  ;;  %32 = vst [vmem:[#allocation6 + $0x8] sm:$0xff] %v30_v4  ;;  %p71_p5 = scmp.ne.s32.totalorder %s40_s17, %s70_s18  ;;  %p76_p7 = scmp.lt.s32.totalorder %s70_s18, %s70_s18 }
  0x12   :  { %p77_p8 = por %p76_p7, %p75_p6 }
  0x14   :  { %p78_p9 = pnand %p77_p8, %p71_p5 }
  0x16   :  { %81 = shalt.err (!%p78_p9)
}
  0x17   :  { %42 = dma.vmem_to_hbm [thread:$0]  %s40_s17, 256, %s122_s2, [#allocation5]  }
  0x18   :  { %92 = dma.done.wait [#allocation5], 256  }
  0x19   :  { %93 = vsyncadd [#allocation5], 4294967040 }
  0x1a   :  { %46 = vsyncpa [#allocation4], 1 }
  0x1b   :  { %47 = vsyncpa [#allocation5], 1 }

</bundles_post_ra>
